<compile_context>
chip_gen: v6e
topology: v6e:2x2x1
jax: 0.10.0
libtpu: 0.0.40
codegen_flags: <defaults>
</compile_context>

<pallas_src>
import functools

import jax
import jax.numpy as jnp
from jax.experimental import pallas as pl
from jax.experimental.pallas import tpu as pltpu


def _round_up(n: int, m: int) -> int:
    return ((n + m - 1) // m) * m


def _round_down(n: int, m: int) -> int:
    return (n // m) * m


def _discriminator_kernel(x_ref, w1_ref, b1_ref, w2_ref, b2_ref, o_ref, *,
                          compute_dtype):
    # ---- Linear(img_dim, 128) ------------------------------------------------
    # Cast the streamed tile to bf16 in VMEM (no extra HBM traffic), then MXU
    # matmul with f32 accumulation.
    x = x_ref[...].astype(compute_dtype)
    h = jnp.dot(x, w1_ref[...], preferred_element_type=jnp.float32)
    h = h + b1_ref[...]                                   # (TB, H) + (1, H)
    # ---- LeakyReLU(0.1): VPU -------------------------------------------------
    h = jnp.where(h > 0, h, 0.1 * h)
    # ---- Linear(128, 1): N==1 -> VPU mul + XLU row-reduce (MXU stays free) ---
    logits = jnp.sum(h * w2_ref[...], axis=-1, keepdims=True) + b2_ref[...]
    # ---- Sigmoid: EUP exp + approximate EUP reciprocal -----------------------
    o_ref[...] = pl.reciprocal(1.0 + jnp.exp(-logits), approx=True).astype(o_ref.dtype)


def _pick_batch_tile(B, D, H, x_itemsize, compute_itemsize, requested_tb):
    """Pick a sublane-aligned batch tile under a v7x-safe VMEM budget."""
    # Buffer budget (bytes): leave headroom under the 48 MiB scoped limit,
    # which itself leaves headroom under v7x's 64 MiB physical VMEM per TC.
    budget = 40 * 1024 * 1024
    # Fixed, tile-independent residents (double-buffered by default):
    #   w1 (D x H, bf16) x2, biases + w2 row (f32).
    fixed = 2 * D * H * compute_itemsize + 4 * H * 4
    # Per-batch-row cost: double-buffered x tile (native dtype), the in-kernel
    # bf16 cast temp, the f32 (TB, H) intermediate, plus output slack.
    per_row = 2 * D * x_itemsize + D * compute_itemsize + H * 4 + 64
    tb_vmem = max(16, _round_down(max(budget - fixed, per_row), per_row) // per_row * 0 +
                  _round_down((budget - fixed) // per_row, 16))
    # Guarantee >= 2 grid tiles so both v7x TensorCores get work.
    tb_two_core = max(16, _round_up(pl.cdiv(B, 2), 16))
    tb_req = max(16, _round_down(requested_tb, 16))
    return max(16, min(tb_req, tb_vmem, tb_two_core))


@functools.partial(jax.jit, static_argnames=("tb", "compute_dtype"))
def discriminator_forward(x, w1, b1, w2, b2, *, tb=4096,
                          compute_dtype=jnp.bfloat16):
    """Fused MLP forward.  x: (B, D) -> (B, 1) f32.

    Weights are stored transposed vs. PyTorch: w1: (D, 128), w2: (128, 1);
    biases are (1, 128) and (1, 1).  x may be f32 or bf16; the bf16 cast for
    the MXU happens inside the kernel (no wrapper-side HBM round trip).
    """
    B, D = x.shape
    H = w1.shape[1]
    assert w1.shape == (D, H) and b1.shape == (1, H)
    assert w2.shape == (H, 1) and b2.shape == (1, 1)

    tb_eff = _pick_batch_tile(B, D, H, x.dtype.itemsize,
                              jnp.dtype(compute_dtype).itemsize, tb)
    grid = (pl.cdiv(B, tb_eff),)   # overhanging last block handled by Pallas

    # Small operands: one-time casts (negligible vs. the B*D x stream).
    w1_c = w1.astype(compute_dtype)                 # MXU operand
    w2_row = w2.reshape(1, H).astype(jnp.float32)   # VPU operand, keep f32
    b1_f = b1.astype(jnp.float32)
    b2_f = b2.astype(jnp.float32)

    kernel = functools.partial(_discriminator_kernel, compute_dtype=compute_dtype)

    out = pl.pallas_call(
        kernel,
        out_shape=jax.ShapeDtypeStruct((B, 1), jnp.float32),
        grid_spec=pltpu.PrefetchScalarGridSpec(
            num_scalar_prefetch=0,
            grid=grid,
            in_specs=[
                pl.BlockSpec((tb_eff, D), lambda i: (i, 0)),  # x: streamed per tile
                pl.BlockSpec((D, H), lambda i: (0, 0)),       # w1: VMEM-resident
                pl.BlockSpec((1, H), lambda i: (0, 0)),       # b1: VMEM-resident
                pl.BlockSpec((1, H), lambda i: (0, 0)),       # w2 row: VMEM-resident
                pl.BlockSpec((1, 1), lambda i: (0, 0)),       # b2: VMEM-resident
            ],
            out_specs=pl.BlockSpec((tb_eff, 1), lambda i: (i, 0)),
        ),
        compiler_params=pltpu.CompilerParams(
            # Batch tiles are independent -> shard across TensorCores (v7x).
            dimension_semantics=("parallel",),
            # Safe on v7x (64 MiB physical); mandatory raise for v5e's 16 MiB
            # scoped default; well under v5e/v6e's 128 MiB physical.
            vmem_limit_bytes=48 * 1024 * 1024,
        ),
    )(x, w1_c, b1_f, w2_row, b2_f)

    return out


def init_discriminator_params(key, img_dim, hidden=128, out=1):
    """Deterministic init mirroring nn.Linear default: U(-1/sqrt(fan_in), ...)."""
    k1, k2, k3, k4 = jax.random.split(key, 4)
    bound1 = 1.0 / jnp.sqrt(img_dim)
    bound2 = 1.0 / jnp.sqrt(hidden)
    w1 = jax.random.uniform(k1, (img_dim, hidden), jnp.float32, -bound1, bound1)
    b1 = jax.random.uniform(k2, (1, hidden), jnp.float32, -bound1, bound1)
    w2 = jax.random.uniform(k3, (hidden, out), jnp.float32, -bound2, bound2)
    b2 = jax.random.uniform(k4, (1, out), jnp.float32, -bound2, bound2)
    return w1, b1, w2, b2


def discriminator_ref(x, w1, b1, w2, b2, compute_dtype=jnp.bfloat16):
    """Pure-JAX reference (matching the bf16 first-layer compute)."""
    h = jnp.dot(x.astype(compute_dtype), w1.astype(compute_dtype),
                preferred_element_type=jnp.float32) + b1
    h = jnp.where(h > 0, h, 0.1 * h)
    logits = jnp.sum(h * w2.reshape(1, -1), axis=-1, keepdims=True) + b2
    return jax.nn.sigmoid(logits)


if __name__ == "__main__":
    key = jax.random.PRNGKey(0)
    kx, kp = jax.random.split(key)

    # Small shapes: B not a multiple of the tile (exercises the partial tail
    # block) and a batch big enough that the two-core cap yields a 2-tile grid.
    B, IMG_DIM = 40, 256
    x = jax.random.normal(kx, (B, IMG_DIM), jnp.float32)
    w1, b1, w2, b2 = init_discriminator_params(kp, IMG_DIM)

    out = discriminator_forward(x, w1, b1, w2, b2)
    out = jax.block_until_ready(out)

    ref = discriminator_ref(x, w1, b1, w2, b2)
    assert out.shape == (B, 1), out.shape
    # Tolerance covers the approximate EUP reciprocal (~1e-4) and reduction-
    # order differences; first-layer bf16 compute is mirrored in the reference.
    assert jnp.allclose(out, ref, atol=2e-3, rtol=2e-3), "mismatch vs reference"
    assert bool(jnp.all(jnp.isfinite(out))), "non-finite outputs"

    print("KERNEL_OK")
</pallas_src>

<mosaic_0001>
module attributes {stable_mosaic.version = 11 : i64} {
  func.func @_discriminator_kernel(%arg0: i32, %arg1: memref<32x256xf32, #tpu.memory_space<vmem>>, %arg2: memref<256x128xbf16, #tpu.memory_space<vmem>>, %arg3: memref<1x128xf32, #tpu.memory_space<vmem>>, %arg4: memref<1x128xf32, #tpu.memory_space<vmem>>, %arg5: memref<1x1xf32, #tpu.memory_space<vmem>>, %arg6: memref<32x1xf32, #tpu.memory_space<vmem>>) attributes {dimension_semantics = [#tpu.dimension_semantics<parallel>], iteration_bounds = array<i64: 2>, scalar_prefetch = 0 : i64, scratch_operands = 0 : i64, tpu.core_type = #tpu.core_type<tc>, window_params = [{transform_indices = @transform_0, window_bounds = array<i64: 32, 256>}, {pipeline_mode = #tpu.pipeline_mode<synchronous>, transform_indices = @transform_1, window_bounds = array<i64: 256, 128>}, {pipeline_mode = #tpu.pipeline_mode<synchronous>, transform_indices = @transform_2, window_bounds = array<i64: 1, 128>}, {pipeline_mode = #tpu.pipeline_mode<synchronous>, transform_indices = @transform_3, window_bounds = array<i64: 1, 128>}, {pipeline_mode = #tpu.pipeline_mode<synchronous>, transform_indices = @transform_4, window_bounds = array<i64: 1, 1>}, {transform_indices = @transform_5, window_bounds = array<i64: 32, 1>}]} {
    %c0 = arith.constant 0 : index
    %c0_0 = arith.constant 0 : index
    %0 = vector.load %arg1[%c0, %c0_0] : memref<32x256xf32, #tpu.memory_space<vmem>>, vector<32x256xf32>
    %1 = arith.truncf %0 : vector<32x256xf32> to vector<32x256xbf16>
    %c0_1 = arith.constant 0 : index
    %c0_2 = arith.constant 0 : index
    %2 = vector.load %arg2[%c0_1, %c0_2] : memref<256x128xbf16, #tpu.memory_space<vmem>>, vector<256x128xbf16>
    %cst = arith.constant dense<0.000000e+00> : vector<32x128xf32>
    %3 = tpu.matmul %1, %2, %cst {dimension_numbers = #tpu.dot_dimension_numbers<[1], [0], [0], [1], [0, 0, 1, 1], [], []>} : vector<32x256xbf16>, vector<256x128xbf16>, vector<32x128xf32> -> vector<32x128xf32>
    %c0_3 = arith.constant 0 : index
    %c0_4 = arith.constant 0 : index
    %4 = vector.load %arg3[%c0_3, %c0_4] : memref<1x128xf32, #tpu.memory_space<vmem>>, vector<1x128xf32>
    %5 = vector.broadcast %4 : vector<1x128xf32> to vector<32x128xf32>
    %6 = arith.addf %3, %5 : vector<32x128xf32>
    %cst_5 = arith.constant 0.000000e+00 : f32
    %7 = vector.broadcast %cst_5 : f32 to vector<32x128xf32>
    %8 = arith.cmpf ogt, %6, %7 : vector<32x128xf32>
    %cst_6 = arith.constant 1.000000e-01 : f32
    %9 = vector.broadcast %cst_6 : f32 to vector<32x128xf32>
    %10 = arith.mulf %9, %6 : vector<32x128xf32>
    %11 = arith.select %8, %6, %10 : vector<32x128xi1>, vector<32x128xf32>
    %c0_7 = arith.constant 0 : index
    %c0_8 = arith.constant 0 : index
    %12 = vector.load %arg4[%c0_7, %c0_8] : memref<1x128xf32, #tpu.memory_space<vmem>>, vector<1x128xf32>
    %13 = vector.broadcast %12 : vector<1x128xf32> to vector<32x128xf32>
    %14 = arith.mulf %11, %13 : vector<32x128xf32>
    %cst_9 = arith.constant dense<0.000000e+00> : vector<32xf32>
    %15 = vector.multi_reduction <add>, %14, %cst_9 [1] : vector<32x128xf32> to vector<32xf32>
    %16 = vector.shape_cast %15 : vector<32xf32> to vector<32x1xf32>
    %c0_10 = arith.constant 0 : index
    %c0_11 = arith.constant 0 : index
    %17 = vector.load %arg5[%c0_10, %c0_11] : memref<1x1xf32, #tpu.memory_space<vmem>>, vector<1x1xf32>
    %18 = vector.broadcast %17 : vector<1x1xf32> to vector<32x1xf32>
    %19 = arith.addf %16, %18 : vector<32x1xf32>
    %cst_12 = arith.constant 0.000000e+00 : f32
    %20 = vector.broadcast %cst_12 : f32 to vector<32x1xf32>
    %21 = arith.subf %20, %19 : vector<32x1xf32>
    %22 = math.exp %21 : vector<32x1xf32>
    %cst_13 = arith.constant 1.000000e+00 : f32
    %23 = vector.broadcast %cst_13 : f32 to vector<32x1xf32>
    %24 = arith.addf %23, %22 : vector<32x1xf32>
    %25 = tpu.reciprocal %24 {approx = true} : vector<32x1xf32> -> vector<32x1xf32>
    %c0_14 = arith.constant 0 : index
    %c0_15 = arith.constant 0 : index
    %26 = vector.load %arg6[%c0_14, %c0_15] : memref<32x1xf32, #tpu.memory_space<vmem>>, vector<32x1xf32>
    tpu.vector_store %arg6[%c0_14, %c0_15], %25 {strides = array<i32>} : memref<32x1xf32, #tpu.memory_space<vmem>>, vector<32x1xf32>,
    return
  }
  func.func @transform_0(%arg0: i32) -> (i32, i32) {
    %c0_i32 = arith.constant 0 : i32
    %c0_i32_0 = arith.constant 0 : i32
    return %arg0, %c0_i32 : i32, i32
  }
  func.func @transform_1(%arg0: i32) -> (i32, i32) {
    %c0_i32 = arith.constant 0 : i32
    %c0_i32_0 = arith.constant 0 : i32
    %c0_i32_1 = arith.constant 0 : i32
    return %c0_i32, %c0_i32_0 : i32, i32
  }
  func.func @transform_2(%arg0: i32) -> (i32, i32) {
    %c0_i32 = arith.constant 0 : i32
    %c0_i32_0 = arith.constant 0 : i32
    %c0_i32_1 = arith.constant 0 : i32
    return %c0_i32, %c0_i32_0 : i32, i32
  }
  func.func @transform_3(%arg0: i32) -> (i32, i32) {
    %c0_i32 = arith.constant 0 : i32
    %c0_i32_0 = arith.constant 0 : i32
    %c0_i32_1 = arith.constant 0 : i32
    return %c0_i32, %c0_i32_0 : i32, i32
  }
  func.func @transform_4(%arg0: i32) -> (i32, i32) {
    %c0_i32 = arith.constant 0 : i32
    %c0_i32_0 = arith.constant 0 : i32
    %c0_i32_1 = arith.constant 0 : i32
    return %c0_i32, %c0_i32_0 : i32, i32
  }
  func.func @transform_5(%arg0: i32) -> (i32, i32) {
    %c0_i32 = arith.constant 0 : i32
    %c0_i32_0 = arith.constant 0 : i32
    return %arg0, %c0_i32 : i32, i32
  }
}

</mosaic_0001>

<bundles_post_ra>
// kernel: discriminator_forward.1
= control target key start
LH: loop header
LB: loop body
LE: loop exit
PB: predicated region body
PF: predicated region fallthrough
CT: control target
= control target key end

     0   :  { %s1245_s0 = inlined_call_operand.vmem [shape: f32[40,256], index: 0, kind: input, shape index: {}]   ;;  %s1246_s1 = inlined_call_operand.vmem [shape: bf16[256,128], index: 1, kind: input, shape index: {}]   ;;  %s1247_s2 = inlined_call_operand.vmem [shape: f32[1,128], index: 2, kind: input, shape index: {}]   ;;  %s1248_s3 = inlined_call_operand.vmem [shape: f32[1,128], index: 3, kind: input, shape index: {}]   ;;  %s1249_s4 = inlined_call_operand.<no memory space> [shape: f32[1,1], index: 4, kind: input, shape index: {}]   ;;  %s1250_s5 = inlined_call_operand.vmem [shape: f32[40,1], index: 5, kind: output, shape index: {}]  }
   0x1   :  { %v10_v0 = vstv %s1249_s4 }
   0x2   :  { %11 = vst [vmem:[#allocation2] sm:$0x1] %v10_v0 }
   0x3   :  { %s1081_s20 = smov 0   ;;  %s1083_s21 = smov 0  }
   0x4   :  { %s1085_s22 = smov 0  }
   0x5 LB: > { %s1094_s4 = sadd.s32 4294967295, %s1014_s22   ;;  %s1096_s23 = sadd.s32 1, %s1014_s22   ;;  %s1014_s22 = sphi %s1085_s22, %s1257_s22   ;;  %s1010_s21 = sphi %s1083_s21, %s1256_s21   ;;  %s1006_s20 = sphi %s1081_s20, %s1255_s20  }
   0x6   : > { %s131_s24 = ssub.s32 %s1014_s22, %s1096_s23  ;;  %s134_s25 = sadd.s32 1, %s1010_s21 }
   0x7   : > { %p132_p0 = scmp.eq.s32.totalorder %s131_s24, 0  ;;  %p144_p1 = scmp.ne.s32.totalorder %s1010_s21, %s1006_s20 }
   0x8   : > { %p145_p2 = scmp.eq.s32.totalorder %s1094_s4, 1  ;;  %p751_p3 = scmp.ge.s32.totalorder %s1014_s22, 1 }
   0x9   : > { %s1104_s26 = scalar_select %p132_p0, %s1010_s21, %s134_s25  }
   0xa   : > { %p1106_p4 = por %p145_p2, %p144_p1  ;;  %p201_p5 = scmp.lt.s32.totalorder %s1014_s22, 3 }
   0xc   : > { %p202_p6 = pnand %p751_p3, %p201_p5 }
   0xd   : > { %s1114_s30 = sshll.u32 (!%p202_p6), %s1094_s4, 2 }
   0xe   : > { %205 = sbr.rel (%p202_p6) target bundleno = 475 (0x1db), region = 40  ;;  %p240_p7 = scmp.lt.s32.totalorder (!%p202_p6), %s1114_s30, 4 }
  0x13   : > { %v928_v1 = vld [vmem:[%s1246_s1 + $0x78] sm:$0xff]   ;;  %v930_v3 = vld [vmem:[%s1246_s1 + $0x70] sm:$0xff]   ;;  %v932_v5 = vld [vmem:[%s1246_s1 + $0x68] sm:$0xff]   ;;  %s241_s14 = scalar_select %p240_p7, %s1114_s30, 4  ;;  %vm515_vm4 = vcmask 7168  }
  0x14   : > { %v929_v2 = vld [vmem:[%s1246_s1 + $0x38] sm:$0xff]   ;;  %796 = vmatprep.subr.bf16.mxu0 %v928_v1  ;;  %824 = vmatprep.subr.bf16.mxu1 %v928_v1  ;;  %v931_v4 = vld [vmem:[%s1246_s1 + $0x30] sm:$0xff]   ;;  %v933_v6 = vld [vmem:[%s1246_s1 + $0x28] sm:$0xff]   ;;  %s793_s10 = sshll.u32 (%p1106_p4), %s1094_s4, 5 }
  0x15   : > { %797 = vmatpush3.bf16.msra.mxu0 %v929_v2  ;;  %832 = vmatpush3.bf16.msra.mxu1 %v929_v2  ;;  %v934_v7 = vld [vmem:[%s1246_s1 + $0x60] sm:$0xff]   ;;  %s792_s19 = sshll.u32 %s241_s14, 4  ;;  %v936_v9 = vld [vmem:[%s1246_s1 + $0x58] sm:$0xff]   ;;  %v938_v11 = vld [vmem:[%s1246_s1 + $0x50] sm:$0xff]   ;;  %s1196_s13 = scalar_lea.vmem (%p1106_p4), %s1250_s5, %s793_s10  }
  0x16   : > { %798 = vmatprep.subr.bf16.mxu0 %v930_v3  ;;  %825 = vmatprep.subr.bf16.mxu1 %v930_v3  ;;  %v935_v8 = vld [vmem:[%s1246_s1 + $0x20] sm:$0xff]   ;;  %s1145_s7 = scalar_lea.vmem %s1245_s0, %s792_s19  ;;  %v937_v10 = vld [vmem:[%s1246_s1 + $0x18] sm:$0xff]   ;;  %v939_v18 = vld [vmem:[%s1246_s1 + $0x10] sm:$0xff]  }
  0x17   : > { %v258_v12 = vld [vmem:[%s1145_s7 + $0x8] sm:$0xff]  ;;  %v260_v13 = vld [vmem:[%s1145_s7 + $0x18] sm:$0xff]  ;;  %v942_v21 = vld [vmem:[%s1246_s1 + $0x40] sm:$0xff]  }
  0x18   : > { %v262_v14 = vld [vmem:[%s1145_s7 + $0x28] sm:$0xff]  ;;  %v266_v15 = vpack.c.bf16 %v260_v13, %v258_v12  ;;  %v264_v16 = vld [vmem:[%s1145_s7 + $0x38] sm:$0xff]  ;;  %v943_v22 = vld [vmem:[%s1246_s1] sm:$0xff]  }
  0x19   : > { %799 = vmatpush3.bf16.msra.mxu0 %v931_v4  ;;  %833 = vmatpush3.bf16.msra.mxu1 %v931_v4  ;;  %v268_v17 = vpack.c.bf16 %v264_v16, %v262_v14  ;;  %v940_v19 = vld [vmem:[%s1246_s1 + $0x48] sm:$0xff]   ;;  %v257_v23 = vld [vmem:[%s1145_s7] sm:$0xff]  ;;  %v259_v24 = vld [vmem:[%s1145_s7 + $0x10] sm:$0xff] }
  0x1a   : > { %800 = vmatprep.subr.bf16.mxu0 %v932_v5  ;;  %826 = vmatprep.subr.bf16.mxu1 %v932_v5  ;;  %v941_v20 = vld [vmem:[%s1246_s1 + $0x8] sm:$0xff]   ;;  %v261_v25 = vld [vmem:[%s1145_s7 + $0x20] sm:$0xff]  ;;  %v263_v26 = vld [vmem:[%s1145_s7 + $0x30] sm:$0xff]  ;;  %v265_v27 = vpack.c.bf16 %v259_v24, %v257_v23  ;;  %s231_s7 = sand.u32 1, %s1006_s20   ;;  %s528_s20 = ssub.s32 (%p1106_p4), 5, %s1114_s30 }
  0x1b   : > { %436 = vmatprep.mubr.bf16.mxu0 %v266_v15  ;;  %444 = vmatprep.mubr.bf16.mxu1 %v268_v17  ;;  %v267_v28 = vpack.c.bf16 %v263_v26, %v261_v25  ;;  %v756_v31 = vld [vmem:[%s1247_s2] ss:$0 sm:$0xff]  ;;  %s752_s8 = sshll.u32 %s231_s7, 5  ;;  %p529_p8 = scmp.lt.s32.totalorder (%p1106_p4), %s528_s20, 4 }
  0x1c   : > { %v773_v45 = vld [vmem:[%s1248_s3] ss:$0 sm:$0xff]  ;;  %s1183_s9 = scalar_lea.vmem [#allocation3], %s752_s8  }
  0x1d   : > { %801 = vmatpush3.bf16.msra.mxu0 %v933_v6  ;;  %834 = vmatpush3.bf16.msra.mxu1 %v933_v6  ;;  %v774_v59 = vld [vmem:[#allocation2] ss:$0 sm:$0xff] }
  0x1e   : > { %802 = vmatprep.subr.bf16.mxu0 %v934_v7  ;;  %827 = vmatprep.subr.bf16.mxu1 %v934_v7 }
  0x21   : > { %803 = vmatpush3.bf16.msra.mxu0 %v935_v8  ;;  %835 = vmatpush3.bf16.msra.mxu1 %v935_v8 }
  0x22   : > { %804 = vmatprep.subr.bf16.mxu0 %v936_v9  ;;  %828 = vmatprep.subr.bf16.mxu1 %v936_v9 }
  0x25   : > { %805 = vmatpush3.bf16.msra.mxu0 %v937_v10  ;;  %836 = vmatpush3.bf16.msra.mxu1 %v937_v10 }
  0x26   : > { %806 = vmatprep.subr.bf16.mxu0 %v938_v11  ;;  %829 = vmatprep.subr.bf16.mxu1 %v938_v11 }
  0x29   : > { %807 = vmatpush3.bf16.msra.mxu0 %v939_v18  ;;  %837 = vmatpush3.bf16.msra.mxu1 %v939_v18 }
  0x2a   : > { %808 = vmatprep.subr.bf16.mxu0 %v940_v19  ;;  %830 = vmatprep.subr.bf16.mxu1 %v940_v19 }
  0x2d   : > { %809 = vmatpush3.bf16.msra.mxu0 %v941_v20  ;;  %838 = vmatpush3.bf16.msra.mxu1 %v941_v20 }
  0x2e   : > { %810 = vmatprep.subr.bf16.mxu0 %v942_v21  ;;  %831 = vmatprep.subr.bf16.mxu1 %v942_v21 }
  0x31   : > { %811 = vmatpush3.bf16.msra.mxu0 %v943_v22  ;;  %839 = vmatpush3.bf16.msra.mxu1 %v943_v22 }
  0x34   : > { %437 = vmatmul.mubr.bf16.vlgmr.msra.gmra.mxu0 %v265_v27  ;;  %445 = vmatmul.mubr.bf16.vlgmr.msra.gmra.mxu1 %v267_v28 }
  0xf4   : > { %v812_v29 = vpop.f32.mrf.mxu0  ;;  %v818_v30 = vpop.f32.mrf.mxu1 }
  0xf6   : > { %v813_v32 = vpop.f32.mrf.mxu0  ;;  %v819_v33 = vpop.f32.mrf.mxu1 }
  0xf7   : > { %v814_v34 = vadd.f32 %v813_v32, %v812_v29  ;;  %v820_v35 = vadd.f32 %v819_v33, %v818_v30 }
  0xf8   : > { %v815_v36 = vpop.f32.mrf.mxu0  ;;  %v821_v37 = vpop.f32.mrf.mxu1 }
  0xf9   : > { %v439_v38 = vadd.f32 %v814_v34, %v756_v31  ;;  %v447_v39 = vadd.f32 %v820_v35, %v756_v31 }
  0xfa   : > { %v816_v40 = vpop.f32.mrf.mxu0  ;;  %v822_v41 = vpop.f32.mrf.mxu1 }
  0xfb   : > { %v817_v42 = vadd.f32 %v816_v40, %v815_v36  ;;  %v823_v43 = vadd.f32 %v822_v41, %v821_v37  ;;  %vm455_vm0 = vcmp.gt.f32.partialorder %v447_v39, 0.0  ;;  %v459_v44 = vmul.f32 0.1, %v447_v39 }
  0xfc   : > { %vm453_vm1 = vcmp.gt.f32.partialorder %v439_v38, 0.0  ;;  %v457_v46 = vmul.f32 0.1, %v439_v38 }
  0xfd   : > { %v442_v47 = vadd.f32 %v817_v42, %v756_v31  ;;  %v450_v48 = vadd.f32 %v823_v43, %v756_v31  ;;  %v463_v49 = vsel %vm455_vm0, %v447_v39, %v459_v44 }
  0xfe   : > { %v474_v50 = vmul.f32 %v773_v45, %v463_v49  ;;  %v461_v51 = vsel %vm453_vm1, %v439_v38, %v457_v46 }
  0xff   : > { %v472_v52 = vmul.f32 %v773_v45, %v461_v51  ;;  %vm456_vm2 = vcmp.gt.f32.partialorder %v450_v48, 0.0  ;;  %v460_v53 = vmul.f32 0.1, %v450_v48  ;;  %vm454_vm3 = vcmp.gt.f32.partialorder %v442_v47, 0.0 }
 0x100   : > { %480 = vadd.xlane.f32.xlu1 %v474_v50  ;;  %v458_v54 = vmul.f32 0.1, %v442_v47 }
 0x101   : > { %476 = vadd.xlane.f32.xlu0 %v472_v52  ;;  %v464_v55 = vsel %vm456_vm2, %v450_v48, %v460_v53 }
 0x102   : > { %v475_v56 = vmul.f32 %v773_v45, %v464_v55  ;;  %v462_v57 = vsel %vm454_vm3, %v442_v47, %v458_v54 }
 0x103   : > { %v473_v58 = vmul.f32 %v773_v45, %v462_v57 }
 0x104   : > { %482 = vadd.xlane.f32.xlu1 %v475_v56 }
 0x105   : > { %478 = vadd.xlane.f32.xlu0 %v473_v58 }
 0x189   : > { %v481_v60 = vpop.xlane.xlu1 %480 }
 0x18a   : > { %v493_v61 = vadd.f32 %v774_v59, %v481_v60  ;;  %v477_v62 = vpop.xlane.xlu0 %476 }
 0x18b   : > { %v491_v63 = vadd.f32 %v774_v59, %v477_v62 }
 0x18c   : > { %v497_v0 = vsub.f32 0.0, %v493_v61 }
 0x18d   : > { %v495_v1 = vsub.f32 0.0, %v491_v63  ;;  %v483_v2 = vpop.xlane.xlu1 %482 }
 0x18e   : > { %v503_v3 = vmul.f32 1.442695, %v497_v0  ;;  %v494_v4 = vadd.f32 %v774_v59, %v483_v2  ;;  %v479_v5 = vpop.xlane.xlu0 %478 }
 0x18f   : > { %v499_v6 = vmul.f32 1.442695, %v495_v1  ;;  %v492_v7 = vadd.f32 %v774_v59, %v479_v5 }
 0x190   : > { %944 = vpow2.f32 %v503_v3  ;;  %v498_v8 = vsub.f32 0.0, %v494_v4 }
 0x191   : > { %946 = vpow2.f32 %v499_v6  ;;  %v496_v9 = vsub.f32 0.0, %v492_v7 }
 0x192   : > { %v505_v10 = vmul.f32 1.442695, %v498_v8 }
 0x193   : > { %v501_v11 = vmul.f32 1.442695, %v496_v9 }
 0x194   : > { %948 = vpow2.f32 %v505_v10 }
 0x195   : > { %950 = vpow2.f32 %v501_v11 }
 0x19d   : > { %v945_v12 = vpop.eup %944 }
 0x19e   : > { %v947_v13 = vpop.eup %946  ;;  %v509_v14 = vadd.f32 1.0, %v945_v12 }
 0x19f   : > { %v507_v15 = vadd.f32 1.0, %v947_v13 }
 0x1a0   : > { %952 = vrcp.f32 %v509_v14 }
 0x1a1   : > { %v949_v16 = vpop.eup %948  ;;  %954 = vrcp.f32 %v507_v15 }
 0x1a2   : > { %v951_v17 = vpop.eup %950  ;;  %v510_v18 = vadd.f32 1.0, %v949_v16 }
 0x1a3   : > { %v508_v19 = vadd.f32 1.0, %v951_v17 }
 0x1a4   : > { %956 = vrcp.f32 %v510_v18 }
 0x1a5   : > { %958 = vrcp.f32 %v508_v19 }
 0x1ad   : > { %v953_v20 = vpop.eup %952 }
 0x1ae   : > { %v955_v21 = vpop.eup %954  ;;  %518 = vst.msk [vmem:[%s1183_s9 + $0x10] sm:$0xff] %vm515_vm4, %v953_v20 }
 0x1af   : > { %516 = vst.msk [vmem:[%s1183_s9] sm:$0xff] %vm515_vm4, %v955_v21  ;;  %526 = sbr.rel (!%p1106_p4) target bundleno = 475 (0x1db), region = 44 }
 0x1b1   : > { %v957_v22 = vpop.eup %956 }
 0x1b2   : > { %v959_v23 = vpop.eup %958  ;;  %519 = vst.msk [vmem:[%s1183_s9 + $0x18] sm:$0xff] %vm515_vm4, %v957_v22 }
 0x1b3   : > { %517 = vst.msk [vmem:[%s1183_s9 + $0x8] sm:$0xff] %vm515_vm4, %v959_v23 }
 0x1b4   : > { %s1259_s20 = smov (!%p529_p8, %s528_s20), 4 }
 0x1b5   : > { %s777_s14 = sshll.u32 %s1259_s20, 7 }
 0x1b6   : > { %p780_p9 = scmp.eq.s32.totalorder %s777_s14, 0 }
 0x1b7   : > { %s1202_s15 = sshrl.u32 (!%p780_p9), %s1259_s20, 2 }
 0x1b8   : > { %537 = sbr.rel (%p780_p9) target bundleno = 475 (0x1db), region = 48  ;;  %p781_p10 = scmp.le.s32.totalorder (!%p780_p9), %s1202_s15, 0 }
 0x1bd   : > { %704 = sbr.rel (%p781_p10) target bundleno = 458 (0x1ca), region = 124  ;;  %s1252_s4 = smov (!%p781_p10), %s1196_s13 }
 0x1be   : > { %s1253_s27 = smov (!%p781_p10), %s1183_s9  ;;  %s1211_s30 = smov (!%p781_p10), 0  }
 0x1bf   : > { %s1028_s16 = smov (!%p781_p10), 0  }
 0x1c2 LB: >> { %v606_v24 = vld [vmem:[%s1022_s27] sm:$0xff]  ;;  %v608_v25 = vld [vmem:[%s1022_s27 + $0x8] sm:$0xff]  ;;  %v610_v26 = vld [vmem:[%s1022_s27 + $0x10] sm:$0xff]  ;;  %s614_s17 = sadd.s32 1, %s1026_s30  ;;  %s600_s16 = sadd.s32 1, %s1030_s16   ;;  %s1030_s16 = sphi %s1028_s16, %s600_s16   ;;  %s1026_s30 = sphi %s1211_s30, %s1254_s30   ;;  %s1022_s27 = sphi %s1253_s27, %s619_s27   ;;  %s1018_s4 = sphi %s1252_s4, %s620_s4  }
 0x1c3   : >> { %607 = vst [vmem:[%s1018_s4] sm:$0xff] %v606_v24  ;;  %609 = vst [vmem:[%s1018_s4 + $0x8] sm:$0xff] %v608_v25  ;;  %v612_v27 = vld [vmem:[%s1022_s27 + $0x18] sm:$0xff]  ;;  %p615_p11 = scmp.ge.s32.totalorder %s614_s17, %s1202_s15  ;;  %p599_p12 = scmp.ge.s32.totalorder %s600_s16, %s1202_s15 }
 0x1c4   : >> { %611 = vst [vmem:[%s1018_s4 + $0x10] sm:$0xff] %v610_v26  ;;  %613 = vst [vmem:[%s1018_s4 + $0x18] sm:$0xff] %v612_v27 }
 0x1c5   : >> { %s1261_s17 = smov (%p615_p11, %s614_s17), 0  ;;  %602 = sbr.rel (!%p599_p12) target bundleno = 450 (0x1c2), region = 130 }
 0x1c6   : >> { %s782_s18 = sshll.u32 %s1261_s17, 5  ;;  %s1254_s30 = smov %s1261_s17 }
 0x1c7   : >> { %s619_s27 = scalar_lea.vmem %s1183_s9, %s782_s18 [#allocation3]   ;;  %s620_s4 = scalar_lea.vmem %s1196_s13, %s782_s18  }
 0x1ca PF: > { %s1227_s19 = sand.u32 3, %s1259_s20   ;;  %s794_s22 = sshll.u32 %s1202_s15, 5 }
 0x1cb   : > { %s625_s24 = scalar_lea.vmem %s1183_s9, %s794_s22 [#allocation3]   ;;  %s627_s25 = scalar_lea.vmem %s1196_s13, %s794_s22  }
 0x1cc   : > { %p787_p13 = scmp.le.s32.totalorder %s1227_s19, 0 }
 0x1cd   : > { %s1032_s28 = smov (!%p787_p13), %s627_s25   ;;  %s1036_s29 = smov (!%p787_p13), %s625_s24  }
 0x1ce   : > { %718 = sbr.rel (%p787_p13) target bundleno = 475 (0x1db), region = 135  ;;  %s1040_s6 = smov (!%p787_p13), 0  }
 0x1cf   : > { %s1044_s7 = smov (!%p787_p13), 0  }
 0x1d3 LB: >> { %v637_v28 = vld [vmem:[%s1038_s29] sm:$0xff]  ;;  %s639_s8 = sadd.s32 1, %s1042_s6  ;;  %s631_s7 = sadd.s32 1, %s1046_s7   ;;  %s1046_s7 = sphi %s1044_s7, %s631_s7   ;;  %s1042_s6 = sphi %s1040_s6, %s1041_s6   ;;  %s1038_s29 = sphi %s1036_s29, %s644_s29   ;;  %s1034_s28 = sphi %s1032_s28, %s645_s28  }
 0x1d4   : >> { %638 = vst [vmem:[%s1034_s28] sm:$0xff] %v637_v28  ;;  %p640_p0 = scmp.ge.s32.totalorder %s639_s8, %s1227_s19  ;;  %p630_p1 = scmp.ge.s32.totalorder %s631_s7, %s1227_s19 }
 0x1d6   : >> { %s1263_s8 = smov (%p640_p0, %s639_s8), 0  ;;  %633 = sbr.rel (!%p630_p1) target bundleno = 467 (0x1d3), region = 141 }
 0x1d7   : >> { %s788_s9 = sshll.u32 %s1263_s8, 3  ;;  %s1041_s6 = smov %s1263_s8  }
 0x1d8   : >> { %s644_s29 = scalar_lea.vmem %s625_s24, %s788_s9 [#allocation3]   ;;  %s645_s28 = scalar_lea.vmem %s627_s25, %s788_s9  }
 0x1db PF: > { %p14_p2 = scmp.ge.s32.totalorder %s1096_s23, 4   ;;  %s1255_s20 = smov %s1010_s21 }
 0x1dc   : > { %s1256_s21 = smov %s1104_s26  ;;  %s1257_s22 = smov %s1096_s23 }
 0x1dd   :  { %16 = sbr.rel (!%p14_p2) target bundleno = 5 (0x5), region = 152 }

</bundles_post_ra>
